<compile_context>
chip_gen: v7x
topology: tpu7x:2x2x1
jax: 0.10.0
libtpu: 0.0.40
codegen_flags: <defaults>
</compile_context>

<pallas_src>
import jax
import jax.numpy as jnp
from jax.experimental import pallas as pl
from jax.experimental.pallas import tpu as pltpu


def _round_up(x, m):
    return ((x + m - 1) // m) * m


# --------------------------------------------------------------------------
# Pallas kernel: TB news items per grid step.
#   emb_ref   : (TB*L, Ep)    bf16  token embeddings (item-major, token-minor)
#   mask_ref  : (TB, L)       f32   attention mask (1.0 = real token, 0.0 = pad)
#   w_ref     : (Ep, Hp+Ap)   bf16  [Wp || Wa] (lane-padded)
#   b_ref     : (1, Hp+Ap)    f32   [bp || ba]
#   v_ref     : (1, Ap)       f32   attention query vector (row layout)
#   emb_out   : (TB*L, Hp)    bf16  per-token news embedding
#   repr_out  : (TB, Hp)      f32   pooled news representation
# --------------------------------------------------------------------------
def _encoder_kernel(emb_ref, mask_ref, w_ref, b_ref, v_ref,
                    emb_out_ref, repr_out_ref):
    tb, seq_len = mask_ref.shape
    hidden = repr_out_ref.shape[-1]                       # Hp (multiple of 128)

    emb2d = emb_ref[...]                                  # [TB*L, Ep] bf16

    # single fused MXU matmul (bf16 operands, f32 accumulation)
    fused = jnp.dot(emb2d, w_ref[...],
                    preferred_element_type=jnp.float32)   # [TB*L, Hp+Ap]
    fused = jnp.tanh(fused + b_ref[...])                  # f32 elementwise

    # lane-aligned split (Hp % 128 == 0) -> no relayout
    proj = fused[:, :hidden]                              # [TB*L, Hp]
    att_h = fused[:, hidden:]                             # [TB*L, Ap]

    # width-1 "matmul" done on VPU + XLU lane reduce (no pathological MXU shape)
    scores = jnp.sum(att_h * v_ref[...], axis=-1,
                     keepdims=True)                       # [TB*L, 1]
    scores = scores.reshape(tb, seq_len)                  # [TB, L]  (L on lanes)

    # masked softmax over the token (lane) axis, per news item
    mask = mask_ref[...]                                  # [TB, L] f32
    s = jnp.where(mask > 0, scores, jnp.float32(-1e9))
    s = s - jnp.max(s, axis=-1, keepdims=True)
    e = jnp.exp(s) * mask                                 # zero out pads exactly
    denom = jnp.sum(e, axis=-1, keepdims=True) + jnp.float32(1e-9)
    w = e * pl.reciprocal(denom, approx=True)             # [TB, L]

    # pooled representation: broadcast weights back only for the final sum
    pooled = jnp.sum(w[:, :, None] * proj.reshape(tb, seq_len, hidden),
                     axis=1)                              # [TB, Hp]

    emb_out_ref[...] = proj.astype(emb_out_ref.dtype)     # bf16 store
    repr_out_ref[...] = pooled.astype(repr_out_ref.dtype)


def encoder_pallas(token_ids, attn_mask, word_emb_bf16, w_comb, b_comb, v_row,
                   *, tile_rows=512):
    """token_ids: [BN, L] int32, attn_mask: [BN, L],
    word_emb_bf16: [V, Ep] bf16, w_comb: [Ep, Hp+Ap] bf16,
    b_comb: [1, Hp+Ap] f32, v_row: [1, Ap] f32.
    Returns (news_embedding [BN, L, Hp] bf16, news_repr [BN, Hp] f32)."""
    BN, L = token_ids.shape
    Ep = word_emb_bf16.shape[1]
    HA = w_comb.shape[1]
    Ap = v_row.shape[1]
    Hp = HA - Ap

    # --- tile selection: TB items/step, ~tile_rows MXU rows per matmul ---
    tb = max(1, tile_rows // L)
    tb = min(tb, BN)
    tb = _round_up(tb, 8)                    # sublane-aligned item blocks
    bn_pad = _round_up(BN, tb)
    grid = (bn_pad // tb,)

    # pad the TINY id / mask arrays before the gather (not the [BN,L,E] tensor)
    if bn_pad != BN:
        pad = bn_pad - BN
        token_ids = jnp.pad(token_ids, ((0, pad), (0, 0)))
        attn_mask = jnp.pad(attn_mask, ((0, pad), (0, 0)))

    # gather directly in bf16 -> kernel input, no extra f32 pass over HBM
    # TODO(synk): fusing this gather into the kernel (scalar-prefetched ids +
    #             pl.Element row gather or manual DMA from word_emb in pl.ANY)
    #             would remove the [BN*L, Ep] intermediate entirely.
    emb2d = word_emb_bf16[token_ids].reshape(bn_pad * L, Ep)   # bf16
    mask2d = attn_mask.astype(jnp.float32)                     # [bn_pad, L]

    grid_spec = pltpu.PrefetchScalarGridSpec(
        num_scalar_prefetch=0,
        grid=grid,
        in_specs=[
            pl.BlockSpec((tb * L, Ep), lambda i: (i, 0)),      # token embeddings
            pl.BlockSpec((tb, L), lambda i: (i, 0)),           # pad mask (lane-dense)
            pl.BlockSpec((Ep, HA), lambda i: (0, 0)),          # [Wp || Wa]
            pl.BlockSpec((1, HA), lambda i: (0, 0)),           # [bp || ba]
            pl.BlockSpec((1, Ap), lambda i: (0, 0)),           # v (row)
        ],
        out_specs=[
            pl.BlockSpec((tb * L, Hp), lambda i: (i, 0)),      # news_embedding (2D, bf16)
            pl.BlockSpec((tb, Hp), lambda i: (i, 0)),          # news_repr (2D, f32)
        ],
    )

    emb_out2d, repr_out2d = pl.pallas_call(
        _encoder_kernel,
        grid_spec=grid_spec,
        out_shape=(
            jax.ShapeDtypeStruct((bn_pad * L, Hp), jnp.bfloat16),
            jax.ShapeDtypeStruct((bn_pad, Hp), jnp.float32),
        ),
        compiler_params=pltpu.CompilerParams(
            dimension_semantics=("parallel",)),
    )(emb2d, mask2d, w_comb, b_comb, v_row)

    news_embedding = emb_out2d.reshape(bn_pad, L, Hp)[:BN]
    news_repr = repr_out2d[:BN]
    return news_embedding, news_repr


# --------------------------------------------------------------------------
# Encoder_Wrapper equivalent
# --------------------------------------------------------------------------
class EncoderWrapperPallas:
    def __init__(self, hparams, params):
        self.name = 'pipeline-synthetic'
        self.level = 1
        self.batch_size = hparams['batch_size']
        self.signal_length = hparams['title_size']
        self.hidden_dim = params['wp'].shape[1]

        E = params['word_emb'].shape[1]
        H = params['wp'].shape[1]
        A = params['wa'].shape[1]
        Ep, Hp, Ap = _round_up(E, 128), _round_up(H, 128), _round_up(A, 128)
        self._E, self._H, self._A = E, H, A
        self._Ep, self._Hp, self._Ap = Ep, Hp, Ap

        # one-time parameter prep: lane-padded, pre-cast (zeros in padding keep
        # the math identical: padded emb cols are 0, padded Wp/Wa cols give
        # tanh(0)=0, padded v entries are 0)
        we = jnp.zeros((params['word_emb'].shape[0], Ep), jnp.bfloat16)
        self.word_emb = we.at[:, :E].set(params['word_emb'].astype(jnp.bfloat16))

        w_comb = jnp.zeros((Ep, Hp + Ap), jnp.float32)
        w_comb = w_comb.at[:E, :H].set(params['wp'])
        w_comb = w_comb.at[:E, Hp:Hp + A].set(params['wa'])
        self.w_comb = w_comb.astype(jnp.bfloat16)                 # [Ep, Hp+Ap]

        b_comb = jnp.zeros((1, Hp + Ap), jnp.float32)
        b_comb = b_comb.at[:, :H].set(params['bp'].reshape(1, H))
        b_comb = b_comb.at[:, Hp:Hp + A].set(params['ba'].reshape(1, A))
        self.b_comb = b_comb                                      # [1, Hp+Ap]

        v_row = jnp.zeros((1, Ap), jnp.float32)
        self.v_row = v_row.at[:, :A].set(params['v'].reshape(1, A))

    def __call__(self, x):
        cand = x['candidate_title']
        if cand.shape[0] != self.batch_size:
            self.batch_size = cand.shape[0]
        news = cand.astype(jnp.int32)                             # .long()
        pad = x['candidate_title_pad']
        # TODO(synk): x['cdd_id'] (news_id) is only used for embedding caching in
        #             the original pipeline encoders; it carries no compute here.
        _ = x['cdd_id'].astype(jnp.int32)

        B, N, L = news.shape
        emb_pad, repr_pad = encoder_pallas(
            news.reshape(B * N, L), pad.reshape(B * N, L),
            self.word_emb, self.w_comb, self.b_comb, self.v_row)

        H = self.hidden_dim
        # strip lane padding (no-op when H is already a multiple of 128)
        news_embedding = emb_pad[:, :, :H].reshape(B, N, L, self.level, H)  # bf16
        news_repr = repr_pad[:, :H].reshape(B, N, H)                        # f32
        return news_embedding, news_repr


# --------------------------------------------------------------------------
# Pure-JAX reference (f32) for correctness check
# --------------------------------------------------------------------------
def encoder_reference(token_emb, attn_mask, wp, bp, wa, ba, v):
    proj = jnp.tanh(token_emb @ wp + bp)                        # [BN, L, H]
    att_h = jnp.tanh(token_emb @ wa + ba)                       # [BN, L, A]
    scores = att_h @ v                                          # [BN, L, 1]
    mask = attn_mask[..., None]
    s = jnp.where(mask > 0, scores, -1e9)
    s = s - jnp.max(s, axis=1, keepdims=True)
    e = jnp.exp(s) * mask
    w = e / (jnp.sum(e, axis=1, keepdims=True) + 1e-9)
    pooled = jnp.sum(w * proj, axis=1)
    return proj, pooled


# --------------------------------------------------------------------------
# Deterministic parameter / input construction + smoke test
# --------------------------------------------------------------------------
def make_params(key, vocab, embed_dim, hidden_dim, attn_dim):
    ks = jax.random.split(key, 5)
    scale = 0.05
    return {
        'word_emb': scale * jax.random.normal(ks[0], (vocab, embed_dim), jnp.float32),
        'wp': scale * jax.random.normal(ks[1], (embed_dim, hidden_dim), jnp.float32),
        'bp': jnp.zeros((1, hidden_dim), jnp.float32),
        'wa': scale * jax.random.normal(ks[2], (embed_dim, attn_dim), jnp.float32),
        'ba': jnp.zeros((1, attn_dim), jnp.float32),
        'v':  scale * jax.random.normal(ks[3], (attn_dim, 1), jnp.float32),
    }


if __name__ == "__main__":
    key = jax.random.PRNGKey(0)
    B, N_CDD, L = 2, 4, 8          # batch, candidate news per sample, title_size
    VOCAB, E, H, A = 100, 32, 32, 32

    k_par, k_tok, k_len = jax.random.split(key, 3)
    params = make_params(k_par, VOCAB, E, H, A)

    hparams = {'batch_size': B, 'title_size': L}
    wrapper = EncoderWrapperPallas(hparams, params)

    token_ids = jax.random.randint(k_tok, (B, N_CDD, L), 1, VOCAB, dtype=jnp.int32)
    lengths = jax.random.randint(k_len, (B, N_CDD), 3, L + 1, dtype=jnp.int32)
    pad_mask = (jnp.arange(L)[None, None, :] < lengths[:, :, None]).astype(jnp.float32)
    cdd_id = jnp.arange(B * N_CDD, dtype=jnp.int32).reshape(B, N_CDD)

    x = {
        'candidate_title': token_ids,
        'candidate_title_pad': pad_mask,
        'cdd_id': cdd_id,
    }

    news_embedding, news_repr = wrapper(x)
    jax.block_until_ready((news_embedding, news_repr))

    assert news_embedding.shape == (B, N_CDD, L, 1, H)
    assert news_repr.shape == (B, N_CDD, H)
    assert bool(jnp.all(jnp.isfinite(news_embedding.astype(jnp.float32))))
    assert bool(jnp.all(jnp.isfinite(news_repr)))

    # correctness check vs f32 reference (bf16 MXU/outputs + approx recip -> loose tol)
    token_emb_ref = params['word_emb'][token_ids.reshape(B * N_CDD, L)]
    proj_ref, pooled_ref = encoder_reference(
        token_emb_ref, pad_mask.reshape(B * N_CDD, L),
        params['wp'], params['bp'], params['wa'], params['ba'], params['v'])
    assert bool(jnp.allclose(news_embedding.reshape(B * N_CDD, L, H).astype(jnp.float32),
                             proj_ref, atol=2e-2, rtol=5e-2))
    assert bool(jnp.allclose(news_repr.reshape(B * N_CDD, H),
                             pooled_ref, atol=2e-2, rtol=5e-2))

    print("KERNEL_OK")
</pallas_src>

<mosaic_0001>
module attributes {stable_mosaic.version = 11 : i64} {
  func.func @_encoder_kernel(%arg0: i32, %arg1: memref<64x128xbf16, #tpu.memory_space<vmem>>, %arg2: memref<8x8xf32, #tpu.memory_space<vmem>>, %arg3: memref<128x256xbf16, #tpu.memory_space<vmem>>, %arg4: memref<1x256xf32, #tpu.memory_space<vmem>>, %arg5: memref<1x128xf32, #tpu.memory_space<vmem>>, %arg6: memref<64x128xbf16, #tpu.memory_space<vmem>>, %arg7: memref<8x128xf32, #tpu.memory_space<vmem>>) attributes {dimension_semantics = [#tpu.dimension_semantics<parallel>], iteration_bounds = array<i64: 1>, scalar_prefetch = 0 : i64, scratch_operands = 0 : i64, tpu.core_type = #tpu.core_type<tc>, window_params = [{transform_indices = @transform_0, window_bounds = array<i64: 64, 128>}, {transform_indices = @transform_1, window_bounds = array<i64: 8, 8>}, {pipeline_mode = #tpu.pipeline_mode<synchronous>, transform_indices = @transform_2, window_bounds = array<i64: 128, 256>}, {pipeline_mode = #tpu.pipeline_mode<synchronous>, transform_indices = @transform_3, window_bounds = array<i64: 1, 256>}, {pipeline_mode = #tpu.pipeline_mode<synchronous>, transform_indices = @transform_4, window_bounds = array<i64: 1, 128>}, {transform_indices = @transform_5, window_bounds = array<i64: 64, 128>}, {transform_indices = @transform_6, window_bounds = array<i64: 8, 128>}]} {
    %c0 = arith.constant 0 : index
    %c0_0 = arith.constant 0 : index
    %0 = vector.load %arg1[%c0, %c0_0] : memref<64x128xbf16, #tpu.memory_space<vmem>>, vector<64x128xbf16>
    %c0_1 = arith.constant 0 : index
    %c0_2 = arith.constant 0 : index
    %1 = vector.load %arg3[%c0_1, %c0_2] : memref<128x256xbf16, #tpu.memory_space<vmem>>, vector<128x256xbf16>
    %cst = arith.constant dense<0.000000e+00> : vector<64x256xf32>
    %2 = tpu.matmul %0, %1, %cst {dimension_numbers = #tpu.dot_dimension_numbers<[1], [0], [0], [1], [0, 0, 1, 1], [], []>} : vector<64x128xbf16>, vector<128x256xbf16>, vector<64x256xf32> -> vector<64x256xf32>
    %c0_3 = arith.constant 0 : index
    %c0_4 = arith.constant 0 : index
    %3 = vector.load %arg4[%c0_3, %c0_4] : memref<1x256xf32, #tpu.memory_space<vmem>>, vector<1x256xf32>
    %4 = vector.broadcast %3 : vector<1x256xf32> to vector<64x256xf32>
    %5 = arith.addf %2, %4 : vector<64x256xf32>
    %6 = math.tanh %5 : vector<64x256xf32>
    %7 = vector.extract_strided_slice %6 {offsets = [0, 0], sizes = [64, 128], strides = [1, 1]} : vector<64x256xf32> to vector<64x128xf32>
    %8 = vector.extract_strided_slice %6 {offsets = [0, 128], sizes = [64, 128], strides = [1, 1]} : vector<64x256xf32> to vector<64x128xf32>
    %c0_5 = arith.constant 0 : index
    %c0_6 = arith.constant 0 : index
    %9 = vector.load %arg5[%c0_5, %c0_6] : memref<1x128xf32, #tpu.memory_space<vmem>>, vector<1x128xf32>
    %10 = vector.broadcast %9 : vector<1x128xf32> to vector<64x128xf32>
    %11 = arith.mulf %8, %10 : vector<64x128xf32>
    %cst_7 = arith.constant dense<0.000000e+00> : vector<64xf32>
    %12 = vector.multi_reduction <add>, %11, %cst_7 [1] : vector<64x128xf32> to vector<64xf32>
    %13 = vector.shape_cast %12 : vector<64xf32> to vector<64x1xf32>
    %14 = vector.shape_cast %13 : vector<64x1xf32> to vector<8x8xf32>
    %c0_8 = arith.constant 0 : index
    %c0_9 = arith.constant 0 : index
    %15 = vector.load %arg2[%c0_8, %c0_9] : memref<8x8xf32, #tpu.memory_space<vmem>>, vector<8x8xf32>
    %cst_10 = arith.constant 0.000000e+00 : f32
    %16 = vector.broadcast %cst_10 : f32 to vector<8x8xf32>
    %17 = arith.cmpf ogt, %15, %16 : vector<8x8xf32>
    %cst_11 = arith.constant -1.000000e+09 : f32
    %18 = vector.broadcast %cst_11 : f32 to vector<8x8xf32>
    %19 = arith.select %17, %14, %18 : vector<8x8xi1>, vector<8x8xf32>
    %cst_12 = arith.constant dense<0xFF800000> : vector<8xf32>
    %20 = vector.multi_reduction <maximumf>, %19, %cst_12 [1] : vector<8x8xf32> to vector<8xf32>
    %21 = vector.shape_cast %20 : vector<8xf32> to vector<8x1xf32>
    %22 = vector.broadcast %21 : vector<8x1xf32> to vector<8x8xf32>
    %23 = arith.subf %19, %22 : vector<8x8xf32>
    %24 = math.exp %23 : vector<8x8xf32>
    %25 = arith.mulf %24, %15 : vector<8x8xf32>
    %cst_13 = arith.constant dense<0.000000e+00> : vector<8xf32>
    %26 = vector.multi_reduction <add>, %25, %cst_13 [1] : vector<8x8xf32> to vector<8xf32>
    %27 = vector.shape_cast %26 : vector<8xf32> to vector<8x1xf32>
    %cst_14 = arith.constant 9.99999971E-10 : f32
    %28 = vector.broadcast %cst_14 : f32 to vector<8x1xf32>
    %29 = arith.addf %27, %28 : vector<8x1xf32>
    %30 = tpu.reciprocal %29 {approx = true} : vector<8x1xf32> -> vector<8x1xf32>
    %31 = vector.broadcast %30 : vector<8x1xf32> to vector<8x8xf32>
    %32 = arith.mulf %25, %31 : vector<8x8xf32>
    %33 = vector.shape_cast %32 : vector<8x8xf32> to vector<8x8x1xf32>
    %34 = vector.shape_cast %7 : vector<64x128xf32> to vector<8x8x128xf32>
    %35 = vector.broadcast %33 : vector<8x8x1xf32> to vector<8x8x128xf32>
    %36 = arith.mulf %35, %34 : vector<8x8x128xf32>
    %cst_15 = arith.constant dense<0.000000e+00> : vector<8x128xf32>
    %37 = vector.multi_reduction <add>, %36, %cst_15 [1] : vector<8x8x128xf32> to vector<8x128xf32>
    %38 = arith.truncf %7 : vector<64x128xf32> to vector<64x128xbf16>
    %c0_16 = arith.constant 0 : index
    %c0_17 = arith.constant 0 : index
    %39 = vector.load %arg6[%c0_16, %c0_17] : memref<64x128xbf16, #tpu.memory_space<vmem>>, vector<64x128xbf16>
    tpu.vector_store %arg6[%c0_16, %c0_17], %38 {strides = array<i32>} : memref<64x128xbf16, #tpu.memory_space<vmem>>, vector<64x128xbf16>,
    %c0_18 = arith.constant 0 : index
    %c0_19 = arith.constant 0 : index
    %40 = vector.load %arg7[%c0_18, %c0_19] : memref<8x128xf32, #tpu.memory_space<vmem>>, vector<8x128xf32>
    tpu.vector_store %arg7[%c0_18, %c0_19], %37 {strides = array<i32>} : memref<8x128xf32, #tpu.memory_space<vmem>>, vector<8x128xf32>,
    return
  }
  func.func @transform_0(%arg0: i32) -> (i32, i32) {
    %c0_i32 = arith.constant 0 : i32
    %c0_i32_0 = arith.constant 0 : i32
    return %arg0, %c0_i32 : i32, i32
  }
  func.func @transform_1(%arg0: i32) -> (i32, i32) {
    %c0_i32 = arith.constant 0 : i32
    %c0_i32_0 = arith.constant 0 : i32
    return %arg0, %c0_i32 : i32, i32
  }
  func.func @transform_2(%arg0: i32) -> (i32, i32) {
    %c0_i32 = arith.constant 0 : i32
    %c0_i32_0 = arith.constant 0 : i32
    %c0_i32_1 = arith.constant 0 : i32
    return %c0_i32, %c0_i32_0 : i32, i32
  }
  func.func @transform_3(%arg0: i32) -> (i32, i32) {
    %c0_i32 = arith.constant 0 : i32
    %c0_i32_0 = arith.constant 0 : i32
    %c0_i32_1 = arith.constant 0 : i32
    return %c0_i32, %c0_i32_0 : i32, i32
  }
  func.func @transform_4(%arg0: i32) -> (i32, i32) {
    %c0_i32 = arith.constant 0 : i32
    %c0_i32_0 = arith.constant 0 : i32
    %c0_i32_1 = arith.constant 0 : i32
    return %c0_i32, %c0_i32_0 : i32, i32
  }
  func.func @transform_5(%arg0: i32) -> (i32, i32) {
    %c0_i32 = arith.constant 0 : i32
    %c0_i32_0 = arith.constant 0 : i32
    return %arg0, %c0_i32 : i32, i32
  }
  func.func @transform_6(%arg0: i32) -> (i32, i32) {
    %c0_i32 = arith.constant 0 : i32
    %c0_i32_0 = arith.constant 0 : i32
    return %arg0, %c0_i32 : i32, i32
  }
}

</mosaic_0001>

<bundles_post_ra>
// kernel: tpu_custom_call.1
= control target key start
LH: loop header
LB: loop body
LE: loop exit
PB: predicated region body
PF: predicated region fallthrough
CT: control target
= control target key end

     0   :  { %12 = vsyncpa [#allocation3], 0  ;;  %s1058_s0 = inlined_call_operand.hbm [shape: bf16[64,128], index: 0, kind: input, shape index: {}]   ;;  %s1059_s1 = inlined_call_operand.hbm [shape: f32[8,8], index: 1, kind: input, shape index: {}]   ;;  %s1060_s2 = inlined_call_operand.hbm [shape: bf16[128,256], index: 2, kind: input, shape index: {}]   ;;  %s1061_s3 = inlined_call_operand.vmem [shape: f32[1,256], index: 3, kind: input, shape index: {}]   ;;  %s1062_s4 = inlined_call_operand.vmem [shape: f32[1,128], index: 4, kind: input, shape index: {}]   ;;  %s1063_s5 = inlined_call_operand.hbm [shape: bf16[64,128], index: 5, kind: output, shape index: {0}]   ;;  %s1064_s6 = inlined_call_operand.hbm [shape: f32[8,128], index: 6, kind: output, shape index: {1}]  }
   0x1   :  { %13 = vsyncpa [#allocation6], 0 }
   0x2   :  { %14 = vsyncpa [#allocation4], 0 }
   0x3   :  { %15 = vsyncpa [#allocation10], 0  ;;  %s867_s21 = smov [#allocation5]   ;;  %s868_s23 = smov [#allocation2]  }
   0x4   :  { %s34_s22 = sshll.u32 %s867_s21, 4  ;;  %s21_s24 = sshll.u32 %s868_s23, 4  ;;  %s35_s22 = int_to_ptr.vmem [resolvable:$true] %s34_s22  ;;  %s912_s24 = int_to_ptr.vmem [resolvable:$true] %s21_s24 }
   0x5   :  { %s749_s27 = scalar_lea.hbm %s1059_s1, 128 }
   0x6   :  { %p750_p0 = scmp.ne.s32.totalorder %s1059_s1, %s749_s27  ;;  %p753_p1 = scmp.lt.u32.totalorder %s749_s27, %s1059_s1 }
   0x8   :  { %p755_p2 = pnand %p753_p1, %p750_p0 }
   0xa   :  { %758 = shalt.err (!%p755_p2)
}
   0xb   :  { %s759_s8 = scalar_lea.vmem %s35_s22, 128  ;;  %p764_p4 = scmp.lt.s32.totalorder %s35_s22, %s35_s22 }
   0xc   :  { %p760_p3 = scmp.ne.s32.totalorder %s35_s22, %s759_s8  ;;  %p765_p5 = scmp.lt.s32.totalorder %s759_s8, %s759_s8 }
   0xe   :  { %p766_p6 = por %p765_p5, %p764_p4 }
  0x10   :  { %p767_p7 = pnand %p766_p6, %p760_p3 }
  0x12   :  { %770 = shalt.err (!%p767_p7)
}
  0x13   :  { %37 = dma.hbm_to_vmem [thread:$0]  %s1059_s1, 128, %s35_s22, [#allocation6]  }
  0x14   :  { %s771_s13 = scalar_lea.hbm %s1058_s0, 512 }
  0x15   :  { %p772_p8 = scmp.ne.s32.totalorder %s1058_s0, %s771_s13  ;;  %p775_p9 = scmp.lt.u32.totalorder %s771_s13, %s1058_s0 }
  0x17   :  { %p777_p10 = pnand %p775_p9, %p772_p8 }
  0x19   :  { %780 = shalt.err (!%p777_p10)
}
  0x1a   :  { %s781_s18 = scalar_lea.vmem %s912_s24, 512  ;;  %p786_p12 = scmp.lt.s32.totalorder %s912_s24, %s912_s24 }
  0x1b   :  { %p782_p11 = scmp.ne.s32.totalorder %s912_s24, %s781_s18  ;;  %p787_p13 = scmp.lt.s32.totalorder %s781_s18, %s781_s18 }
  0x1d   :  { %p788_p0 = por %p787_p13, %p786_p12 }
  0x1f   :  { %p789_p1 = pnand %p788_p0, %p782_p11 }
  0x21   :  { %792 = shalt.err (!%p789_p1)
}
  0x22   :  { %s869_s1 = smov 64   ;;  %s870_s19 = smov 4  }
  0x23   :  { %27 = dma.hbm_to_vmem [thread:$0]  %s1058_s0, 512, %s912_s24, [#allocation3], %s869_s1, %s869_s1, %s870_s19  }
  0x24   :  { %s871_s22 = smov [#allocation7]   ;;  %s793_s27 = scalar_lea.hbm %s1060_s2, 2048 }
  0x25   :  { %s43_s23 = sshll.u32 %s871_s22, 4  ;;  %p794_p2 = scmp.ne.s32.totalorder %s1060_s2, %s793_s27  ;;  %s44_s23 = int_to_ptr.vmem [resolvable:$true] %s43_s23 }
  0x26   :  { %p797_p3 = scmp.lt.u32.totalorder %s793_s27, %s1060_s2 }
  0x28   :  { %p799_p4 = pnand %p797_p3, %p794_p2 }
  0x2a   :  { %802 = shalt.err (!%p799_p4)
}
  0x2b   :  { %s803_s8 = scalar_lea.vmem %s44_s23, 2048  ;;  %p808_p6 = scmp.lt.s32.totalorder %s44_s23, %s44_s23 }
  0x2c   :  { %p804_p5 = scmp.ne.s32.totalorder %s44_s23, %s803_s8  ;;  %p809_p7 = scmp.lt.s32.totalorder %s803_s8, %s803_s8 }
  0x2e   :  { %p810_p8 = por %p809_p7, %p808_p6 }
  0x30   :  { %p811_p9 = pnand %p810_p8, %p804_p5 }
  0x32   :  { %814 = shalt.err (!%p811_p9)
}
  0x33   :  { %s872_s0 = smov 128   ;;  %s873_s24 = smov 8  }
  0x34   :  { %49 = dma.hbm_to_vmem [thread:$0]  %s1060_s2, 2048, %s44_s23, [#allocation6], %s872_s0, %s872_s0, %s873_s24  }
  0x35   :  { %859 = dma.done.wait [#allocation3], 512  }
  0x36   :  { %860 = vsyncadd [#allocation3], 4294966784 }
  0x37   :  { %861 = dma.done.wait [#allocation6], 2176  }
  0x38   :  { %862 = vsyncadd [#allocation6], 4294965120  ;;  %v874_v0 = vmov 0   ;;  %v685_v1 = vld [vmem:[#allocation7 + $0x4] ss:$8 sps:$4 sm:$0xff]   ;;  %v709_v17 = vld [vmem:[#allocation2] sm:$0xff]   ;;  %v90_v21 = vlaneseq }
  0x39   :  { %236 = vmatprep.mubr.bf16.mxu0 %v874_v0  ;;  %256 = vmatprep.mubr.bf16.mxu1 %v874_v0  ;;  %v687_v2 = vld [vmem:[#allocation7] ss:$8 sps:$4 sm:$0xff]   ;;  %v688_v3 = vld [vmem:[#allocation7 + $0x14] ss:$8 sps:$4 sm:$0xff]   ;;  %v690_v4 = vld [vmem:[#allocation7 + $0x10] ss:$8 sps:$4 sm:$0xff]  }
  0x3a   :  { %204 = vmatprep.subr.bf16.mxu0 %v685_v1  ;;  %659 = vmatprep.subr.bf16.mxu1 %v685_v1  ;;  %v691_v5 = vld [vmem:[#allocation7 + $0x24] ss:$8 sps:$4 sm:$0xff]   ;;  %v693_v6 = vld [vmem:[#allocation7 + $0x20] ss:$8 sps:$4 sm:$0xff]   ;;  %v694_v7 = vld [vmem:[#allocation7 + $0x34] ss:$8 sps:$4 sm:$0xff]  }
  0x3b   :  { %205 = vmatpush1.bf16.msra.mxu0 %v687_v2  ;;  %667 = vmatpush1.bf16.msra.mxu1 %v687_v2  ;;  %v696_v8 = vld [vmem:[#allocation7 + $0x30] ss:$8 sps:$4 sm:$0xff]   ;;  %v697_v9 = vld [vmem:[#allocation7 + $0x44] ss:$8 sps:$4 sm:$0xff]   ;;  %v699_v10 = vld [vmem:[#allocation7 + $0x40] ss:$8 sps:$4 sm:$0xff]  }
  0x3c   :  { %206 = vmatprep.subr.bf16.mxu0 %v688_v3  ;;  %660 = vmatprep.subr.bf16.mxu1 %v688_v3  ;;  %v700_v11 = vld [vmem:[#allocation7 + $0x54] ss:$8 sps:$4 sm:$0xff]   ;;  %v702_v12 = vld [vmem:[#allocation7 + $0x50] ss:$8 sps:$4 sm:$0xff]   ;;  %v703_v13 = vld [vmem:[#allocation7 + $0x64] ss:$8 sps:$4 sm:$0xff]  }
  0x3d   :  { %v705_v14 = vld [vmem:[#allocation7 + $0x60] ss:$8 sps:$4 sm:$0xff]   ;;  %v706_v15 = vld [vmem:[#allocation7 + $0x74] ss:$8 sps:$4 sm:$0xff]   ;;  %v708_v16 = vld [vmem:[#allocation7 + $0x70] ss:$8 sps:$4 sm:$0xff]  }
  0x3e   :  { %v710_v18 = vld [vmem:[#allocation2 + $0x10] sm:$0xff]   ;;  %v711_v19 = vld [vmem:[#allocation2 + $0x8] sm:$0xff]   ;;  %v712_v20 = vld [vmem:[#allocation2 + $0x18] sm:$0xff]   ;;  %v959_v22 = vshrl.u32 %v90_v21, 7  ;;  %vm368_vm0 = vcmask 1041409   ;;  %vm370_vm1 = vcmask 1042434  }
  0x3f   :  { %207 = vmatpush1.bf16.msra.mxu0 %v690_v4  ;;  %668 = vmatpush1.bf16.msra.mxu1 %v690_v4  ;;  %v88_v24 = vld [vmem:[%s1061_s3] sm:$0x3]  ;;  %vm372_vm2 = vcmask 1043459   ;;  %vm374_vm3 = vcmask 1044484   ;;  %vm376_vm4 = vcmask 1045509   ;;  %vm378_vm5 = vcmask 1046534  }
  0x40   :  { %208 = vmatprep.subr.bf16.mxu0 %v691_v5  ;;  %661 = vmatprep.subr.bf16.mxu1 %v691_v5  ;;  %v92_v23 = vsub.s32 0, %v959_v22  ;;  %v96_v25 = vsub.s32 1, %v959_v22  ;;  %v619_v60 = vld [vmem:[%s1062_s4] ss:$0 sm:$0xff]  ;;  %vm380_vm6 = vcmask 1047559   ;;  %vm384_vm8 = vcmask 64512  }
  0x41   :  { %s875_s4 = smov [#allocation8]  }
  0x42   :  { %v93_v26 = vrot.slane %v88_v24, %v92_v23  ;;  %v97_v27 = vrot.slane %v88_v24, %v96_v25  ;;  %s572_s13 = sshll.u32 %s875_s4, 4  ;;  %s573_s13 = int_to_ptr.vmem [resolvable:$true] %s572_s13 }
  0x43   :  { %209 = vmatpush1.bf16.msra.mxu0 %v693_v6  ;;  %669 = vmatpush1.bf16.msra.mxu1 %v693_v6  ;;  %s815_s14 = scalar_lea.vmem %s573_s13, 512  ;;  %p820_p11 = scmp.lt.s32.totalorder %s573_s13, %s573_s13 }
  0x44   :  { %210 = vmatprep.subr.bf16.mxu0 %v694_v7  ;;  %662 = vmatprep.subr.bf16.mxu1 %v694_v7  ;;  %p816_p10 = scmp.ne.s32.totalorder %s573_s13, %s815_s14  ;;  %p821_p12 = scmp.lt.s32.totalorder %s815_s14, %s815_s14 }
  0x46   :  { %p822_p13 = por %p821_p12, %p820_p11 }
  0x47   :  { %211 = vmatpush1.bf16.msra.mxu0 %v696_v8  ;;  %670 = vmatpush1.bf16.msra.mxu1 %v696_v8 }
  0x48   :  { %212 = vmatprep.subr.bf16.mxu0 %v697_v9  ;;  %663 = vmatprep.subr.bf16.mxu1 %v697_v9  ;;  %p823_p0 = pnand %p822_p13, %p816_p10 }
  0x4b   :  { %213 = vmatpush1.bf16.msra.mxu0 %v699_v10  ;;  %671 = vmatpush1.bf16.msra.mxu1 %v699_v10 }
  0x4c   :  { %214 = vmatprep.subr.bf16.mxu0 %v700_v11  ;;  %664 = vmatprep.subr.bf16.mxu1 %v700_v11 }
  0x4f   :  { %215 = vmatpush1.bf16.msra.mxu0 %v702_v12  ;;  %672 = vmatpush1.bf16.msra.mxu1 %v702_v12 }
  0x50   :  { %216 = vmatprep.subr.bf16.mxu0 %v703_v13  ;;  %665 = vmatprep.subr.bf16.mxu1 %v703_v13 }
  0x53   :  { %217 = vmatpush1.bf16.msra.mxu0 %v705_v14  ;;  %673 = vmatpush1.bf16.msra.mxu1 %v705_v14 }
  0x54   :  { %218 = vmatprep.subr.bf16.mxu0 %v706_v15  ;;  %666 = vmatprep.subr.bf16.mxu1 %v706_v15 }
  0x57   :  { %219 = vmatpush1.bf16.msra.mxu0 %v708_v16  ;;  %674 = vmatpush1.bf16.msra.mxu1 %v708_v16 }
  0x5a   :  { %237 = vmatmul.mubr.bf16.vlgmr.msra.gmra.mrb[0].mxu0 %v709_v17  ;;  %257 = vmatmul.mubr.bf16.vlgmr.msra.gmra.mrb[0].mxu1 %v710_v18 }
  0x5b   :  { %246 = vmatprep.mubr.bf16.mxu0 %v874_v0  ;;  %266 = vmatprep.mubr.bf16.mxu1 %v874_v0 }
  0x62   :  { %247 = vmatmul.mubr.bf16.gmra.mrb[4].mxu0 %v711_v19  ;;  %267 = vmatmul.mubr.bf16.gmra.mrb[4].mxu1 %v712_v20 }
 0x12d   :  { %v238_v28 = vpop.f32.mrb[0].mxu0  ;;  %v258_v29 = vpop.f32.mrb[0].mxu1 }
 0x12e   :  { %v239_v30 = vadd.f32 %v238_v28, %v93_v26  ;;  %v259_v31 = vadd.f32 %v258_v29, %v93_v26  ;;  %v240_v32 = vpop.f32.mrb[1].mxu0  ;;  %v260_v33 = vpop.f32.mrb[1].mxu1 }
 0x12f   :  { %v241_v34 = vadd.f32 %v240_v32, %v97_v27  ;;  %v261_v35 = vadd.f32 %v260_v33, %v97_v27  ;;  %v242_v36 = vpop.f32.mrb[2].mxu0  ;;  %v262_v37 = vpop.f32.mrb[2].mxu1 }
 0x130   :  { %713 = vtanh.f32 %v239_v30  ;;  %v243_v38 = vadd.f32 %v242_v36, %v93_v26  ;;  %v244_v39 = vpop.f32.mrb[3].mxu0  ;;  %v264_v40 = vpop.f32.mrb[3].mxu1  ;;  %v263_v41 = vadd.f32 %v262_v37, %v93_v26  ;;  %v335_v30 = vand.u32 127, %v90_v21 }
 0x131   :  { %715 = vtanh.f32 %v259_v31  ;;  %v245_v42 = vadd.f32 %v244_v39, %v97_v27  ;;  %v265_v43 = vadd.f32 %v264_v40, %v97_v27 }
 0x132   :  { %717 = vtanh.f32 %v241_v34  ;;  %v338_v33 = vsub.s32 %v335_v30, %v959_v22 }
 0x133   :  { %719 = vtanh.f32 %v261_v35 }
 0x134   :  { %721 = vtanh.f32 %v243_v38 }
 0x135   :  { %723 = vtanh.f32 %v263_v41  ;;  %v248_v44 = vpop.f32.mrb[4].mxu0  ;;  %v268_v45 = vpop.f32.mrb[4].mxu1 }
 0x136   :  { %725 = vtanh.f32 %v245_v42  ;;  %v249_v46 = vadd.f32 %v248_v44, %v93_v26  ;;  %v250_v47 = vpop.f32.mrb[5].mxu0  ;;  %v270_v48 = vpop.f32.mrb[5].mxu1  ;;  %v269_v54 = vadd.f32 %v268_v45, %v93_v26  ;;  %v324_v44 = vld [vmem:[#allocation5] sm:$0xff] }
 0x137   :  { %727 = vtanh.f32 %v265_v43  ;;  %v251_v49 = vadd.f32 %v250_v47, %v97_v27  ;;  %v252_v50 = vpop.f32.mrb[6].mxu0  ;;  %v272_v51 = vpop.f32.mrb[6].mxu1  ;;  %v271_v57 = vadd.f32 %v270_v48, %v97_v27  ;;  %vm325_vm7 = vcmp.gt.f32.partialorder %v324_v44, 0.0 }
 0x138   :  { %729 = vtanh.f32 %v249_v46  ;;  %v253_v52 = vadd.f32 %v252_v50, %v93_v26  ;;  %v254_v53 = vpop.f32.mrb[7].mxu0  ;;  %v274_v55 = vpop.f32.mrb[7].mxu1  ;;  %v273_v59 = vadd.f32 %v272_v51, %v93_v26 }
 0x139   :  { %731 = vtanh.f32 %v251_v49  ;;  %v255_v56 = vadd.f32 %v254_v53, %v97_v27  ;;  %v275_v0 = vadd.f32 %v274_v55, %v97_v27 }
 0x13a   :  { %v970_v58 = vpop.eup %713  ;;  %733 = vtanh.f32 %v253_v52 }
 0x13b   :  { %v975_v61 = vpop.eup %715  ;;  %735 = vtanh.f32 %v255_v56 }
 0x13c   :  { %v718_v62 = vpop.eup %717  ;;  %737 = vtanh.f32 %v269_v54 }
 0x13d   :  { %v720_v63 = vpop.eup %719  ;;  %739 = vtanh.f32 %v271_v57  ;;  %v300_v1 = vmul.f32 %v718_v62, %v619_v60 }
 0x13e   :  { %v977_v2 = vpop.eup %721  ;;  %741 = vtanh.f32 %v273_v59  ;;  %v304_v15 = vmul.f32 %v720_v63, %v619_v60 }
 0x13f   :  { %v979_v3 = vpop.eup %723  ;;  %308 = vadd.xlane.f32.xlu0 %v300_v1  ;;  %v639_v4 = vpack.c.bf16 %v977_v2, %v970_v58  ;;  %743 = vtanh.f32 %v275_v0 }
 0x140   :  { %v726_v5 = vpop.eup %725  ;;  %v649_v6 = vpack.c.bf16 %v979_v3, %v975_v61 }
 0x141   :  { %v728_v7 = vpop.eup %727  ;;  %v301_v8 = vmul.f32 %v726_v5, %v619_v60  ;;  %640 = vst [vmem:[#allocation8] sm:$0xff] %v639_v4  }
 0x142   :  { %v985_v9 = vpop.eup %729  ;;  %v305_v10 = vmul.f32 %v728_v7, %v619_v60  ;;  %657 = vst [vmem:[#allocation8 + $0x10] sm:$0xff] %v649_v6  }
 0x143   :  { %v732_v11 = vpop.eup %731  ;;  %310 = vadd.xlane.f32.xlu0 %v301_v8  ;;  %v414_v8 = vsub.s32 2, %v959_v22 }
 0x144   :  { %v987_v12 = vpop.eup %733  ;;  %318 = vadd.xlane.f32.xlu1 %v305_v10  ;;  %v302_v13 = vmul.f32 %v732_v11, %v619_v60  ;;  %v428_v10 = vsub.s32 4, %v959_v22 }
 0x145   :  { %v736_v14 = vpop.eup %735  ;;  %v644_v16 = vpack.c.bf16 %v987_v12, %v985_v9 }
 0x146   :  { %v991_v17 = vpop.eup %737  ;;  %v303_v26 = vmul.f32 %v736_v14, %v619_v60  ;;  %v421_v14 = vsub.s32 3, %v959_v22 }
 0x147   :  { %v740_v18 = vpop.eup %739  ;;  %316 = vadd.xlane.f32.xlu0 %v304_v15  ;;  %656 = vst [vmem:[#allocation8 + $0x8] sm:$0xff] %v644_v16   ;;  %v442_v15 = vsub.s32 6, %v959_v22 }
 0x148   :  { %v993_v19 = vpop.eup %741  ;;  %312 = vadd.xlane.f32.xlu1 %v302_v13  ;;  %v306_v20 = vmul.f32 %v740_v18, %v619_v60 }
 0x149   :  { %v654_v24 = vpack.c.bf16 %v993_v19, %v991_v17  ;;  %v744_v27 = vpop.eup %743 }
 0x14a   :  { %v307_v28 = vmul.f32 %v744_v27, %v619_v60 }
 0x14b   :  { %320 = vadd.xlane.f32.xlu0 %v306_v20  ;;  %658 = vst [vmem:[#allocation8 + $0x18] sm:$0xff] %v654_v24   ;;  %v449_v20 = vsub.s32 7, %v959_v22 }
 0x14c   :  { %314 = vadd.xlane.f32.xlu1 %v303_v26 }
 0x150   :  { %322 = vadd.xlane.f32.xlu1 %v307_v28 }
 0x1cc   :  { %v309_v29 = vpop.xlane.xlu0 %308 }
 0x1cd   :  { %v339_v38 = vrot.slane %v309_v29, %v338_v33 }
 0x1d0   :  { %v311_v31 = vpop.xlane.xlu0 %310 }
 0x1d1   :  { %v319_v32 = vpop.xlane.xlu1 %318  ;;  %v343_v36 = vrot.slane %v311_v31, %v338_v33 }
 0x1d2   :  { %v359_v45 = vrot.slane %v319_v32, %v338_v33 }
 0x1d3   :  { %v369_v40 = vsel %vm368_vm0, %v343_v36, %v339_v38 }
 0x1d4   :  { %v317_v34 = vpop.xlane.xlu0 %316 }
 0x1d5   :  { %v313_v35 = vpop.xlane.xlu1 %312  ;;  %v355_v43 = vrot.slane %v317_v34, %v338_v33 }
 0x1d6   :  { %v347_v37 = vrot.slane %v313_v35, %v338_v33 }
 0x1d8   :  { %v321_v42 = vpop.xlane.xlu0 %320  ;;  %v371_v21 = vsel %vm370_vm1, %v347_v37, %v369_v40 }
 0x1d9   :  { %v315_v39 = vpop.xlane.xlu1 %314  ;;  %v363_v48 = vrot.slane %v321_v42, %v338_v33 }
 0x1da   :  { %v351_v41 = vrot.slane %v315_v39, %v338_v33 }
 0x1dc   :  { %v373_v46 = vsel %vm372_vm2, %v351_v41, %v371_v21 }
 0x1dd   :  { %v375_v47 = vsel %vm374_vm3, %v355_v43, %v373_v46  ;;  %v323_v49 = vpop.xlane.xlu1 %322 }
 0x1de   :  { %v367_v50 = vrot.slane %v323_v49, %v338_v33  ;;  %v377_v51 = vsel %vm376_vm4, %v359_v45, %v375_v47 }
 0x1df   :  { %v379_v52 = vsel %vm378_vm5, %v363_v48, %v377_v51 }
 0x1e0   :  { %v381_v53 = vsel %vm380_vm6, %v367_v50, %v379_v52 }
 0x1e1   :  { %v383_v54 = vsel %vm325_vm7, %v381_v53, -1e+09 }
 0x1e2   :  { %v385_v55 = vsel %vm384_vm8, %v383_v54, -inf }
 0x1e3   :  { %386 = vmax.xlane.f32.xlu0 %v385_v55 }
 0x270   :  { %v387_v56 = vpop.xlane.xlu0 %386 }
 0x271   :  { %v388_v57 = vsub.f32 %v383_v54, %v387_v56 }
 0x273   :  { %v389_v59 = vmul.f32 1.442695, %v388_v57 }
 0x275   :  { %745 = vpow2.f32 %v389_v59 }
 0x27f   :  { %v746_v60 = vpop.eup %745 }
 0x280   :  { %v391_v62 = vmul.f32 %v746_v60, %v324_v44 }
 0x282   :  { %v392_v63 = vsel %vm384_vm8, %v391_v62, 0.0 }
 0x283   :  { %393 = vadd.xlane.f32.xlu1 %v392_v63 }
 0x310   :  { %v394_v0 = vpop.xlane.xlu1 %393 }
 0x311   :  { %v395_v1 = vadd.f32 1e-09, %v394_v0 }
 0x313   :  { %747 = vrcp.f32 %v395_v1 }
 0x31d   :  { %v748_v4 = vpop.eup %747 }
 0x31e   :  { %v397_v5 = vmul.f32 %v748_v4, %v391_v62 }
 0x320   :  { %v408_v6 = vrot.slane %v397_v5, %v96_v25  ;;  %v401_v7 = vrot.slane %v397_v5, %v92_v23  ;;  %v415_v11 = vrot.slane %v397_v5, %v414_v8  ;;  %v429_v13 = vrot.slane %v397_v5, %v428_v10 }
 0x321   :  { %v422_v16 = vrot.slane %v397_v5, %v421_v14  ;;  %v443_v18 = vrot.slane %v397_v5, %v442_v15  ;;  %v435_v25 = vsub.s32 5, %v959_v22  ;;  %v450_v24 = vrot.slane %v397_v5, %v449_v20 }
 0x322   :  { %410 = vbcast.lane.b32.xlu1 %v408_v6, 256  ;;  %403 = vbcast.lane.b32.xlu0 %v401_v7, 256 }
 0x323   :  { %v436_v23 = vrot.slane %v397_v5, %v435_v25 }
 0x326   :  { %417 = vbcast.lane.b32.xlu1 %v415_v11, 256  ;;  %431 = vbcast.lane.b32.xlu0 %v429_v13, 256 }
 0x32a   :  { %424 = vbcast.lane.b32.xlu1 %v422_v16, 256  ;;  %445 = vbcast.lane.b32.xlu0 %v443_v18, 256 }
 0x32e   :  { %438 = vbcast.lane.b32.xlu1 %v436_v23, 256 }
 0x332   :  { %452 = vbcast.lane.b32.xlu1 %v450_v24, 256 }
 0x333   :  { %826 = shalt.err (!%p823_p0)
}
 0x334   :  { %s827_s17 = scalar_lea.hbm %s1063_s5, 512 }
 0x335   :  { %p828_p1 = scmp.ne.s32.totalorder %s1063_s5, %s827_s17  ;;  %p831_p2 = scmp.lt.u32.totalorder %s827_s17, %s1063_s5 }
 0x337   :  { %p833_p3 = pnand %p831_p2, %p828_p1 }
 0x339   :  { %836 = shalt.err (!%p833_p3)
}
 0x33a   :  { %578 = dma.vmem_to_hbm [thread:$0]  %s573_s13, 512, %s1063_s5, [#allocation4], %s869_s1, %s869_s1, %s870_s19  }
 0x33b   :  { %s876_s5 = smov [#allocation9]  }
 0x33c   :  { %s585_s1 = sshll.u32 %s876_s5, 4  ;;  %s586_s1 = int_to_ptr.vmem [resolvable:$true] %s585_s1 }
 0x33d   :  { %s837_s19 = scalar_lea.vmem %s586_s1, 128  ;;  %p842_p5 = scmp.lt.s32.totalorder %s586_s1, %s586_s1 }
 0x33e   :  { %p838_p4 = scmp.ne.s32.totalorder %s586_s1, %s837_s19  ;;  %p843_p6 = scmp.lt.s32.totalorder %s837_s19, %s837_s19 }
 0x340   :  { %p844_p7 = por %p843_p6, %p842_p5 }
 0x342   :  { %p845_p8 = pnand %p844_p7, %p838_p4 }
 0x394   :  { %v411_v22 = vpop.permute.xlu1 %410  ;;  %v404_v26 = vpop.permute.xlu0 %403 }
 0x395   :  { %v455_v27 = vmul.f32 %v977_v2, %v411_v22  ;;  %v454_v28 = vmul.f32 %v970_v58, %v404_v26 }
 0x397   :  { %v468_v29 = vrot.slane %v455_v27, 4  ;;  %v462_v30 = vrot.slane %v454_v28, 4 }
 0x398   :  { %v418_v31 = vpop.permute.xlu1 %417  ;;  %v432_v32 = vpop.permute.xlu0 %431 }
 0x399   :  { %v469_v33 = vadd.f32 %v468_v29, %v455_v27  ;;  %v463_v34 = vadd.f32 %v462_v30, %v454_v28  ;;  %v456_v35 = vmul.f32 %v985_v9, %v418_v31  ;;  %v458_v36 = vmul.f32 %v975_v61, %v432_v32 }
 0x39b   :  { %v470_v37 = vrot.slane %v469_v33, 2  ;;  %v464_v38 = vrot.slane %v463_v34, 2  ;;  %v474_v39 = vrot.slane %v456_v35, 4  ;;  %v486_v40 = vrot.slane %v458_v36, 4 }
 0x39c   :  { %v425_v41 = vpop.permute.xlu1 %424  ;;  %v446_v42 = vpop.permute.xlu0 %445 }
 0x39d   :  { %v471_v21 = vadd.f32 %v470_v37, %v469_v33  ;;  %v475_v2 = vadd.f32 %v474_v39, %v456_v35  ;;  %v487_v43 = vadd.f32 %v486_v40, %v458_v36  ;;  %v465_v58 = vadd.f32 %v464_v38, %v463_v34 }
 0x39e   :  { %v457_v44 = vmul.f32 %v987_v12, %v425_v41  ;;  %v460_v45 = vmul.f32 %v991_v17, %v446_v42 }
 0x39f   :  { %v476_v46 = vrot.slane %v475_v2, 2  ;;  %v472_v49 = vrot.slane %v471_v21, 1  ;;  %v488_v50 = vrot.slane %v487_v43, 2  ;;  %v466_v51 = vrot.slane %v465_v58, 1 }
 0x3a0   :  { %v480_v47 = vrot.slane %v457_v44, 4  ;;  %v498_v48 = vrot.slane %v460_v45, 4  ;;  %v439_v9 = vpop.permute.xlu1 %438 }
 0x3a1   :  { %v477_v61 = vadd.f32 %v476_v46, %v475_v2  ;;  %v459_v54 = vmul.f32 %v979_v3, %v439_v9  ;;  %v489_v12 = vadd.f32 %v488_v50, %v487_v43  ;;  %v473_v62 = vadd.f32 %v472_v49, %v471_v21 }
 0x3a2   :  { %v481_v52 = vadd.f32 %v480_v47, %v457_v44  ;;  %v499_v53 = vadd.f32 %v498_v48, %v460_v45  ;;  %v467_v63 = vadd.f32 %v466_v51, %v465_v58 }
 0x3a3   :  { %v478_v55 = vrot.slane %v477_v61, 1  ;;  %v492_v59 = vrot.slane %v459_v54, 4  ;;  %v490_v10 = vrot.slane %v489_v12, 1 }
 0x3a4   :  { %v482_v56 = vrot.slane %v481_v52, 2  ;;  %v500_v57 = vrot.slane %v499_v53, 2  ;;  %v453_v60 = vpop.permute.xlu1 %452  ;;  %v558_v3 = vsel %vm368_vm0, %v473_v62, %v467_v63 }
 0x3a5   :  { %v461_v17 = vmul.f32 %v993_v19, %v453_v60  ;;  %v493_v1 = vadd.f32 %v492_v59, %v459_v54  ;;  %v479_v4 = vadd.f32 %v478_v55, %v477_v61  ;;  %v491_v23 = vadd.f32 %v490_v10, %v489_v12 }
 0x3a6   :  { %v483_v0 = vadd.f32 %v482_v56, %v481_v52  ;;  %v501_v7 = vadd.f32 %v500_v57, %v499_v53 }
 0x3a7   :  { %v504_v5 = vrot.slane %v461_v17, 4  ;;  %v494_v8 = vrot.slane %v493_v1, 2  ;;  %v559_v15 = vsel %vm370_vm1, %v479_v4, %v558_v3 }
 0x3a8   :  { %v484_v6 = vrot.slane %v483_v0, 1  ;;  %v502_v18 = vrot.slane %v501_v7, 1 }
 0x3a9   :  { %v505_v11 = vadd.f32 %v504_v5, %v461_v17  ;;  %v495_v14 = vadd.f32 %v494_v8, %v493_v1 }
 0x3aa   :  { %v485_v13 = vadd.f32 %v484_v6, %v483_v0  ;;  %v503_v27 = vadd.f32 %v502_v18, %v501_v7 }
 0x3ab   :  { %v506_v16 = vrot.slane %v505_v11, 2  ;;  %v496_v25 = vrot.slane %v495_v14, 1 }
 0x3ac   :  { %v560_v19 = vsel %vm372_vm2, %v485_v13, %v559_v15 }
 0x3ad   :  { %v507_v20 = vadd.f32 %v506_v16, %v505_v11  ;;  %v497_v24 = vadd.f32 %v496_v25, %v495_v14  ;;  %v561_v26 = vsel %vm374_vm3, %v491_v23, %v560_v19 }
 0x3af   :  { %v508_v22 = vrot.slane %v507_v20, 1  ;;  %v562_v28 = vsel %vm376_vm4, %v497_v24, %v561_v26 }
 0x3b0   :  { %v563_v30 = vsel %vm378_vm5, %v503_v27, %v562_v28 }
 0x3b1   :  { %v509_v29 = vadd.f32 %v508_v22, %v507_v20 }
 0x3b3   :  { %v564_v31 = vsel %vm380_vm6, %v509_v29, %v563_v30 }
 0x3b4   :  { %566 = vst [vmem:[#allocation9] sm:$0xff] %v564_v31 }
 0x3b5   :  { %848 = shalt.err (!%p845_p8)
}
 0x3b6   :  { %s849_s28 = scalar_lea.hbm %s1064_s6, 128 }
 0x3b7   :  { %p850_p9 = scmp.ne.s32.totalorder %s1064_s6, %s849_s28  ;;  %p853_p10 = scmp.lt.u32.totalorder %s849_s28, %s1064_s6 }
 0x3b9   :  { %p855_p11 = pnand %p853_p10, %p850_p9 }
 0x3bb   :  { %858 = shalt.err (!%p855_p11)
}
 0x3bc   :  { %588 = dma.vmem_to_hbm [thread:$0]  %s586_s1, 128, %s1064_s6, [#allocation10]  }
 0x3bd   :  { %863 = dma.done.wait [#allocation4], 512  }
 0x3be   :  { %864 = vsyncadd [#allocation4], 4294966784 }
 0x3bf   :  { %865 = dma.done.wait [#allocation10], 128  }
 0x3c0   :  { %866 = vsyncadd [#allocation10], 4294967168 }
 0x3c1   :  { %595 = vsyncpa [#allocation3], 1 }
 0x3c2   :  { %596 = vsyncpa [#allocation6], 1 }
 0x3c3   :  { %597 = vsyncpa [#allocation4], 1 }
 0x3c4   :  { %598 = vsyncpa [#allocation10], 1 }

</bundles_post_ra>
